<compile_context>
chip_gen: v7x
topology: tpu7x:2x2x1
jax: 0.10.0
libtpu: 0.0.40
codegen_flags: <defaults>
</compile_context>

<pallas_src>
import jax
import jax.numpy as jnp
from jax.experimental import pallas as pl
from jax.experimental.pallas import tpu as pltpu

EPS = 1e-5           # nn.LayerNorm default eps
NEG_SLOPE = 0.01     # F.leaky_relu default negative_slope
MAX_TILE_E = 1024    # edge-dimension tile upper bound (sweepable: 256/512/1024/2048)


# ----------------------------------------------------------------------------
# Tiling helpers (generation-aware)
# ----------------------------------------------------------------------------
def _num_tensorcores():
    """TensorCores per device: v7x (and megacore v4/v5p) expose 2, v5e/v6e 1."""
    try:
        kind = jax.devices()[0].device_kind.lower().replace(" ", "")
    except Exception:
        return 1
    if any(tag in kind for tag in ("7x", "v7", "v4", "v5p")):
        return 2
    return 1


def _choose_tiling(e, max_tile=MAX_TILE_E, num_tc=1):
    """Return (tile_e, grid_steps).  tile_e is a multiple of 128 and as large
    as possible; on multi-TC chips the step count is rounded up to a multiple
    of the core count so every TensorCore gets equal work (padding tiles land
    on the otherwise-idle core)."""
    n_blk = max(1, pl.cdiv(e, 128))          # 128-lane blocks of real data
    max_blk = max(1, max_tile // 128)
    steps = pl.cdiv(n_blk, max_blk)
    if num_tc > 1 and n_blk >= num_tc:
        steps = max(steps, num_tc)
        if steps % num_tc:
            steps += num_tc - (steps % num_tc)
    tile_e = pl.cdiv(n_blk, steps) * 128
    return tile_e, steps


def _full_spec(a):
    return pl.BlockSpec(a.shape, lambda i: (0,) * a.ndim)


def _layernorm_no_affine(h):
    """LayerNorm over the feature (sublane) axis, affine already folded away.
    var = E[h^2] - mean^2; per-element work is one mul + one sub."""
    mean = jnp.mean(h, axis=0, keepdims=True)            # [1, T]  (XLU reduce)
    msq = jnp.mean(h * h, axis=0, keepdims=True)         # [1, T]  (XLU reduce)
    var = jnp.maximum(msq - mean * mean, 0.0)             # guard tiny negatives
    scale = jax.lax.rsqrt(var + EPS)                       # [1, T]  (EUP)
    return h * scale - mean * scale                        # fused normalize


# ----------------------------------------------------------------------------
# Kernel 1: per-edge MLP (feature-major: h is [D, TILE_E])
#   for i in hidden layers: h = LN_noaffine(leaky_relu(Wf_i^T @ h + bf_i))
#   y = relu(wf_last @ h + bf_last)          -> [1, TILE_E] (lane-dense output)
# LN affines are pre-folded into (Wf, bf) of the following layer.
# ----------------------------------------------------------------------------
def _make_edge_mlp_kernel(num_hidden):
    def kernel(x_ref, *refs):
        out_ref = refs[-1]
        p = refs[:-1]
        h = x_ref[...]                                    # [D_pad, T] f32
        for li in range(num_hidden):
            wt = p[2 * li][...]                           # [h1, fan_in(_pad)]
            b = p[2 * li + 1][...]                        # [h1, 1]
            h = jnp.dot(wt, h, preferred_element_type=jnp.float32) + b   # MXU
            h = jnp.maximum(h, NEG_SLOPE * h)             # leaky_relu (2 VPU ops)
            h = _layernorm_no_affine(h)
        # Last layer (N=1): zero-padded [8, h1] row-block on the MXU, row 0 real.
        w_row8 = p[2 * num_hidden][...]                   # [8, h1]
        b_last = p[2 * num_hidden + 1][...]               # [1, 1]
        y8 = jnp.dot(w_row8, h, preferred_element_type=jnp.float32)      # [8, T]
        y = y8[0:1, :] + b_last                           # [1, T]
        out_ref[...] = jnp.maximum(y, 0.0)                # relu
    return kernel


def edge_mlp(y_in_pad, lin_params, norm_params, tile_e):
    """y_in_pad: [D_pad, E_pad] feature-major -> [1, E_pad]."""
    d_pad, e_pad = y_in_pad.shape
    num_hidden = len(norm_params)

    # Fold each LN's affine into the NEXT linear layer (exact algebra):
    #   (hn*g + be) @ W + b  ==  hn @ (diag(g) W) + (be @ W + b)
    flat = []
    g_prev = be_prev = None
    for i in range(num_hidden):
        w, b = lin_params[i]                              # [fan_in, h1], [1, h1]
        if g_prev is not None:
            b = b + be_prev @ w
            w = g_prev.reshape(-1, 1) * w
        g_prev, be_prev = norm_params[i]
        wt = w.T                                          # [h1, fan_in]
        if i == 0 and wt.shape[1] < d_pad:                # pad K to sublane tile
            wt = jnp.pad(wt, ((0, 0), (0, d_pad - wt.shape[1])))
        flat += [wt, b.reshape(-1, 1)]
    w, b = lin_params[-1]                                 # [h1, 1], [1, 1]
    b = b + be_prev @ w
    w = g_prev.reshape(-1, 1) * w
    w_row8 = jnp.pad(w.T, ((0, 7), (0, 0)))               # [8, h1], rows 1..7 zero
    flat += [w_row8, b.reshape(1, 1)]

    kernel = _make_edge_mlp_kernel(num_hidden)
    return pl.pallas_call(
        kernel,
        out_shape=jax.ShapeDtypeStruct((1, e_pad), jnp.float32),
        grid_spec=pltpu.PrefetchScalarGridSpec(
            num_scalar_prefetch=0,
            grid=(e_pad // tile_e,),
            in_specs=[pl.BlockSpec((d_pad, tile_e), lambda i: (0, i))]
            + [_full_spec(a) for a in flat],
            out_specs=pl.BlockSpec((1, tile_e), lambda i: (0, i)),
        ),
        compiler_params=pltpu.CompilerParams(dimension_semantics=("parallel",)),
    )(y_in_pad, *flat)


# ----------------------------------------------------------------------------
# Kernel 2: factors model + final multiply (feature-major, packed input)
#   x = [x_s_d; y_sum_i; x_s_c; y_sum_j; y; 0; 0; 0]   (8 rows x TILE_E lanes)
#   coef = relu(W2f LN_noaffine(relu(W1 x[0:4] + b1)) + b2f);   out = y * coef
# The LN affine is pre-folded into (W2f, b2f); W1 is zero-padded so the y row
# and the padding rows contribute nothing to the first matmul.
# ----------------------------------------------------------------------------
def factors_kernel(x_ref, w1t_ref, b1_ref, w2r_ref, b2_ref, out_ref):
    x = x_ref[...]                                        # [8, T]
    h = jnp.dot(w1t_ref[...], x, preferred_element_type=jnp.float32) + b1_ref[...]
    h = jnp.maximum(h, 0.0)                               # ReLU
    # Dropout -> identity (inference)
    h = _layernorm_no_affine(h)
    c8 = jnp.dot(w2r_ref[...], h, preferred_element_type=jnp.float32)    # [8, T]
    c = jnp.maximum(c8[0:1, :] + b2_ref[...], 0.0)        # ReLU, [1, T]
    out_ref[...] = x[4:5, :] * c                          # y (row 4) * coef


def factors_apply(fx_pad, fparams, tile_e):
    """fx_pad: [8, E_pad] packed feature-major input -> [1, E_pad]."""
    d_pad, e_pad = fx_pad.shape
    w1, b1, g, be, w2, b2 = fparams                       # w1 [4,h2], w2 [h2,1]
    # Fold the LN affine into the second linear.
    b2f = b2 + be @ w2                                    # [1, 1]
    w2f = g.reshape(-1, 1) * w2                           # [h2, 1]
    w1t = jnp.pad(w1.T, ((0, 0), (0, d_pad - w1.shape[0])))   # [h2, 8], cols 4..7 zero
    b1c = b1.reshape(-1, 1)                               # [h2, 1]
    w2r8 = jnp.pad(w2f.T, ((0, 7), (0, 0)))               # [8, h2], rows 1..7 zero
    b2c = b2f.reshape(1, 1)
    return pl.pallas_call(
        factors_kernel,
        out_shape=jax.ShapeDtypeStruct((1, e_pad), jnp.float32),
        grid_spec=pltpu.PrefetchScalarGridSpec(
            num_scalar_prefetch=0,
            grid=(e_pad // tile_e,),
            in_specs=[pl.BlockSpec((d_pad, tile_e), lambda i: (0, i)),
                      _full_spec(w1t), _full_spec(b1c),
                      _full_spec(w2r8), _full_spec(b2c)],
            out_specs=pl.BlockSpec((1, tile_e), lambda i: (0, i)),
        ),
        compiler_params=pltpu.CompilerParams(dimension_semantics=("parallel",)),
    )(fx_pad, w1t, b1c, w2r8, b2c)


# ----------------------------------------------------------------------------
# Full forward (glue in plain JAX: gathers, concats, scatter-add, padding)
# ----------------------------------------------------------------------------
def fnn_v2_forward(params, x_s, x_t, edge_index, edge_weight, max_tile=MAX_TILE_E):
    lin_params, norm_params, fparams = params
    ei0, ei1 = edge_index[0], edge_index[1]

    x_s_d = x_s[:, 1][ei0]                                # [E]
    x_s_c = x_t[:, 1][ei1]                                # [E]
    # Feature-major input: [D_in, E] — edges on lanes.
    y_in = jnp.concatenate([x_s_d[None, :], x_s_c[None, :], edge_weight.T], axis=0)

    d_in, e = y_in.shape
    num_tc = _num_tensorcores()
    tile_e, steps = _choose_tiling(e, max_tile, num_tc)
    e_pad = tile_e * steps
    d_pad = ((d_in + 7) // 8) * 8
    y_in_pad = jnp.pad(y_in, ((0, d_pad - d_in), (0, e_pad - e)))

    y = edge_mlp(y_in_pad, lin_params, norm_params, tile_e)[0, :e]    # [E]

    # index_add_ (scatter-add) + gather — plain JAX glue.
    y_sum_i = jnp.zeros((x_s.shape[0],), y.dtype).at[ei0].add(y)[ei0]
    y_sum_j = jnp.zeros((x_t.shape[0],), y.dtype).at[ei1].add(y)[ei1]

    # Packed factors input: 4 coef features + y (+ zero rows to 8 sublanes).
    fx = jnp.stack([x_s_d, y_sum_i, x_s_c, y_sum_j, y], axis=0)        # [5, E]
    fx_pad = jnp.pad(fx, ((0, 8 - fx.shape[0]), (0, e_pad - e)))       # [8, E_pad]

    out = factors_apply(fx_pad, fparams, tile_e)[0, :e]                # [E]
    return out


# Pure-JAX reference (un-folded math) for sanity checking.
def fnn_v2_reference(params, x_s, x_t, edge_index, edge_weight):
    lin_params, norm_params, fparams = params
    ei0, ei1 = edge_index[0], edge_index[1]
    x_s_d = x_s[:, 1][ei0][:, None]
    x_s_c = x_t[:, 1][ei1][:, None]
    y = jnp.concatenate([x_s_d, x_s_c, edge_weight], axis=1)

    def ln(h, g, be):
        m = jnp.mean(h, axis=-1, keepdims=True)
        v = jnp.mean((h - m) ** 2, axis=-1, keepdims=True)
        return (h - m) * jax.lax.rsqrt(v + EPS) * g + be

    for i, (g, be) in enumerate(norm_params):
        w, b = lin_params[i]
        y = y @ w + b
        y = jnp.where(y > 0, y, NEG_SLOPE * y)
        y = ln(y, g, be)
    w, b = lin_params[-1]
    y = jnp.maximum(y @ w + b, 0.0)[:, 0]

    y_sum_i = jnp.zeros((x_s.shape[0],), y.dtype).at[ei0].add(y)[ei0][:, None]
    y_sum_j = jnp.zeros((x_t.shape[0],), y.dtype).at[ei1].add(y)[ei1][:, None]
    coef = jnp.concatenate([x_s_d, y_sum_i, x_s_c, y_sum_j], axis=1)
    w1, b1, g, be, w2, b2 = fparams
    h = jnp.maximum(coef @ w1 + b1, 0.0)
    h = ln(h, g, be)
    coef = jnp.maximum(h @ w2 + b2, 0.0)[:, 0]
    return y * coef


# ----------------------------------------------------------------------------
# Deterministic parameter init (PyTorch nn.Linear-style uniform).  LayerNorm
# affines are initialised NON-trivially so the folded path is actually tested.
# ----------------------------------------------------------------------------
def init_params(key, input_dim, h1, h2, output_dim, num_layers):
    def linear(key, fan_in, fan_out):
        k1, k2 = jax.random.split(key)
        bound = 1.0 / jnp.sqrt(fan_in)
        w = jax.random.uniform(k1, (fan_in, fan_out), jnp.float32, -bound, bound)
        b = jax.random.uniform(k2, (1, fan_out), jnp.float32, -bound, bound)
        return w, b

    def ln_affine(key, dim):
        k1, k2 = jax.random.split(key)
        g = 1.0 + 0.1 * jax.random.normal(k1, (1, dim), jnp.float32)
        be = 0.1 * jax.random.normal(k2, (1, dim), jnp.float32)
        return g, be

    keys = jax.random.split(key, 2 * num_layers + 3)
    lin_params = [linear(keys[0], input_dim, h1)]
    for i in range(num_layers - 2):
        lin_params.append(linear(keys[1 + i], h1, h1))
    lin_params.append(linear(keys[num_layers - 1], h1, output_dim))

    norm_params = [ln_affine(keys[num_layers + i], h1) for i in range(num_layers - 1)]

    w1, b1 = linear(keys[2 * num_layers - 1], 4, h2)
    g2, be2 = ln_affine(keys[2 * num_layers], h2)
    w2, b2 = linear(keys[2 * num_layers + 1], h2, 1)
    fparams = (w1, b1, g2, be2, w2, b2)
    return lin_params, norm_params, fparams


if __name__ == "__main__":
    key = jax.random.PRNGKey(0)
    k_par, k_xs, k_xt, k_e0, k_e1, k_ew = jax.random.split(key, 6)

    # Small synthetic problem sizes.
    n_s, n_t, num_edges = 10, 12, 37
    feat_s, feat_t = 3, 3
    input_dim, hidden_dim_1, hidden_dim_2, output_dim = 4, 32, 16, 1
    num_layers, dropout = 3, 0.5  # dropout unused at inference

    params = init_params(k_par, input_dim, hidden_dim_1, hidden_dim_2,
                         output_dim, num_layers)

    x_s = jax.random.normal(k_xs, (n_s, feat_s), jnp.float32)
    x_t = jax.random.normal(k_xt, (n_t, feat_t), jnp.float32)
    edge_index = jnp.stack([
        jax.random.randint(k_e0, (num_edges,), 0, n_s),
        jax.random.randint(k_e1, (num_edges,), 0, n_t),
    ], axis=0)
    edge_weight = jax.random.normal(k_ew, (num_edges, input_dim - 2), jnp.float32)

    out = fnn_v2_forward(params, x_s, x_t, edge_index, edge_weight)
    out = jax.block_until_ready(out)

    ref = fnn_v2_reference(params, x_s, x_t, edge_index, edge_weight)
    assert out.shape == (num_edges,)
    assert jnp.allclose(out, ref, atol=1e-3, rtol=1e-3), "mismatch vs reference"

    print("KERNEL_OK")
</pallas_src>

<mosaic_0001>
module attributes {stable_mosaic.version = 11 : i64} {
  func.func @kernel(%arg0: i32, %arg1: memref<8x128xf32, #tpu.memory_space<vmem>>, %arg2: memref<32x8xf32, #tpu.memory_space<vmem>>, %arg3: memref<32x1xf32, #tpu.memory_space<vmem>>, %arg4: memref<32x32xf32, #tpu.memory_space<vmem>>, %arg5: memref<32x1xf32, #tpu.memory_space<vmem>>, %arg6: memref<8x32xf32, #tpu.memory_space<vmem>>, %arg7: memref<1x1xf32, #tpu.memory_space<vmem>>, %arg8: memref<1x128xf32, #tpu.memory_space<vmem>>) attributes {dimension_semantics = [#tpu.dimension_semantics<parallel>], iteration_bounds = array<i64: 1>, scalar_prefetch = 0 : i64, scratch_operands = 0 : i64, tpu.core_type = #tpu.core_type<tc>, window_params = [{transform_indices = @transform_0, window_bounds = array<i64: 8, 128>}, {pipeline_mode = #tpu.pipeline_mode<synchronous>, transform_indices = @transform_1, window_bounds = array<i64: 32, 8>}, {pipeline_mode = #tpu.pipeline_mode<synchronous>, transform_indices = @transform_2, window_bounds = array<i64: 32, 1>}, {pipeline_mode = #tpu.pipeline_mode<synchronous>, transform_indices = @transform_3, window_bounds = array<i64: 32, 32>}, {pipeline_mode = #tpu.pipeline_mode<synchronous>, transform_indices = @transform_4, window_bounds = array<i64: 32, 1>}, {pipeline_mode = #tpu.pipeline_mode<synchronous>, transform_indices = @transform_5, window_bounds = array<i64: 8, 32>}, {pipeline_mode = #tpu.pipeline_mode<synchronous>, transform_indices = @transform_6, window_bounds = array<i64: 1, 1>}, {transform_indices = @transform_7, window_bounds = array<i64: 1, 128>}]} {
    %c0 = arith.constant 0 : index
    %c0_0 = arith.constant 0 : index
    %0 = vector.load %arg1[%c0, %c0_0] : memref<8x128xf32, #tpu.memory_space<vmem>>, vector<8x128xf32>
    %c0_1 = arith.constant 0 : index
    %c0_2 = arith.constant 0 : index
    %1 = vector.load %arg2[%c0_1, %c0_2] : memref<32x8xf32, #tpu.memory_space<vmem>>, vector<32x8xf32>
    %c0_3 = arith.constant 0 : index
    %c0_4 = arith.constant 0 : index
    %2 = vector.load %arg3[%c0_3, %c0_4] : memref<32x1xf32, #tpu.memory_space<vmem>>, vector<32x1xf32>
    %cst = arith.constant dense<0.000000e+00> : vector<32x128xf32>
    %3 = tpu.matmul %1, %0, %cst {dimension_numbers = #tpu.dot_dimension_numbers<[1], [0], [0], [1], [0, 0, 1, 1], [], []>} : vector<32x8xf32>, vector<8x128xf32>, vector<32x128xf32> -> vector<32x128xf32>
    %4 = vector.broadcast %2 : vector<32x1xf32> to vector<32x128xf32>
    %5 = arith.addf %3, %4 : vector<32x128xf32>
    %cst_5 = arith.constant 0.00999999977 : f32
    %6 = vector.broadcast %cst_5 : f32 to vector<32x128xf32>
    %7 = arith.mulf %6, %5 : vector<32x128xf32>
    %8 = arith.maximumf %5, %7 : vector<32x128xf32>
    %cst_6 = arith.constant dense<0.000000e+00> : vector<128xf32>
    %9 = vector.multi_reduction <add>, %8, %cst_6 [0] : vector<32x128xf32> to vector<128xf32>
    %10 = vector.shape_cast %9 : vector<128xf32> to vector<1x128xf32>
    %cst_7 = arith.constant 3.200000e+01 : f32
    %11 = vector.broadcast %cst_7 : f32 to vector<1x128xf32>
    %12 = arith.divf %10, %11 : vector<1x128xf32>
    %13 = arith.mulf %8, %8 : vector<32x128xf32>
    %cst_8 = arith.constant dense<0.000000e+00> : vector<128xf32>
    %14 = vector.multi_reduction <add>, %13, %cst_8 [0] : vector<32x128xf32> to vector<128xf32>
    %15 = vector.shape_cast %14 : vector<128xf32> to vector<1x128xf32>
    %cst_9 = arith.constant 3.200000e+01 : f32
    %16 = vector.broadcast %cst_9 : f32 to vector<1x128xf32>
    %17 = arith.divf %15, %16 : vector<1x128xf32>
    %18 = arith.mulf %12, %12 : vector<1x128xf32>
    %19 = arith.subf %17, %18 : vector<1x128xf32>
    %cst_10 = arith.constant 0.000000e+00 : f32
    %20 = vector.broadcast %cst_10 : f32 to vector<1x128xf32>
    %21 = arith.maximumf %19, %20 : vector<1x128xf32>
    %cst_11 = arith.constant 9.99999974E-6 : f32
    %22 = vector.broadcast %cst_11 : f32 to vector<1x128xf32>
    %23 = arith.addf %21, %22 : vector<1x128xf32>
    %24 = math.rsqrt %23 : vector<1x128xf32>
    %25 = vector.broadcast %24 : vector<1x128xf32> to vector<32x128xf32>
    %26 = arith.mulf %8, %25 : vector<32x128xf32>
    %27 = arith.mulf %12, %24 : vector<1x128xf32>
    %28 = vector.broadcast %27 : vector<1x128xf32> to vector<32x128xf32>
    %29 = arith.subf %26, %28 : vector<32x128xf32>
    %c0_12 = arith.constant 0 : index
    %c0_13 = arith.constant 0 : index
    %30 = vector.load %arg4[%c0_12, %c0_13] : memref<32x32xf32, #tpu.memory_space<vmem>>, vector<32x32xf32>
    %c0_14 = arith.constant 0 : index
    %c0_15 = arith.constant 0 : index
    %31 = vector.load %arg5[%c0_14, %c0_15] : memref<32x1xf32, #tpu.memory_space<vmem>>, vector<32x1xf32>
    %cst_16 = arith.constant dense<0.000000e+00> : vector<32x128xf32>
    %32 = tpu.matmul %30, %29, %cst_16 {dimension_numbers = #tpu.dot_dimension_numbers<[1], [0], [0], [1], [0, 0, 1, 1], [], []>} : vector<32x32xf32>, vector<32x128xf32>, vector<32x128xf32> -> vector<32x128xf32>
    %33 = vector.broadcast %31 : vector<32x1xf32> to vector<32x128xf32>
    %34 = arith.addf %32, %33 : vector<32x128xf32>
    %cst_17 = arith.constant 0.00999999977 : f32
    %35 = vector.broadcast %cst_17 : f32 to vector<32x128xf32>
    %36 = arith.mulf %35, %34 : vector<32x128xf32>
    %37 = arith.maximumf %34, %36 : vector<32x128xf32>
    %cst_18 = arith.constant dense<0.000000e+00> : vector<128xf32>
    %38 = vector.multi_reduction <add>, %37, %cst_18 [0] : vector<32x128xf32> to vector<128xf32>
    %39 = vector.shape_cast %38 : vector<128xf32> to vector<1x128xf32>
    %cst_19 = arith.constant 3.200000e+01 : f32
    %40 = vector.broadcast %cst_19 : f32 to vector<1x128xf32>
    %41 = arith.divf %39, %40 : vector<1x128xf32>
    %42 = arith.mulf %37, %37 : vector<32x128xf32>
    %cst_20 = arith.constant dense<0.000000e+00> : vector<128xf32>
    %43 = vector.multi_reduction <add>, %42, %cst_20 [0] : vector<32x128xf32> to vector<128xf32>
    %44 = vector.shape_cast %43 : vector<128xf32> to vector<1x128xf32>
    %cst_21 = arith.constant 3.200000e+01 : f32
    %45 = vector.broadcast %cst_21 : f32 to vector<1x128xf32>
    %46 = arith.divf %44, %45 : vector<1x128xf32>
    %47 = arith.mulf %41, %41 : vector<1x128xf32>
    %48 = arith.subf %46, %47 : vector<1x128xf32>
    %cst_22 = arith.constant 0.000000e+00 : f32
    %49 = vector.broadcast %cst_22 : f32 to vector<1x128xf32>
    %50 = arith.maximumf %48, %49 : vector<1x128xf32>
    %cst_23 = arith.constant 9.99999974E-6 : f32
    %51 = vector.broadcast %cst_23 : f32 to vector<1x128xf32>
    %52 = arith.addf %50, %51 : vector<1x128xf32>
    %53 = math.rsqrt %52 : vector<1x128xf32>
    %54 = vector.broadcast %53 : vector<1x128xf32> to vector<32x128xf32>
    %55 = arith.mulf %37, %54 : vector<32x128xf32>
    %56 = arith.mulf %41, %53 : vector<1x128xf32>
    %57 = vector.broadcast %56 : vector<1x128xf32> to vector<32x128xf32>
    %58 = arith.subf %55, %57 : vector<32x128xf32>
    %c0_24 = arith.constant 0 : index
    %c0_25 = arith.constant 0 : index
    %59 = vector.load %arg6[%c0_24, %c0_25] : memref<8x32xf32, #tpu.memory_space<vmem>>, vector<8x32xf32>
    %c0_26 = arith.constant 0 : index
    %c0_27 = arith.constant 0 : index
    %60 = vector.load %arg7[%c0_26, %c0_27] : memref<1x1xf32, #tpu.memory_space<vmem>>, vector<1x1xf32>
    %cst_28 = arith.constant dense<0.000000e+00> : vector<8x128xf32>
    %61 = tpu.matmul %59, %58, %cst_28 {dimension_numbers = #tpu.dot_dimension_numbers<[1], [0], [0], [1], [0, 0, 1, 1], [], []>} : vector<8x32xf32>, vector<32x128xf32>, vector<8x128xf32> -> vector<8x128xf32>
    %62 = vector.extract_strided_slice %61 {offsets = [0, 0], sizes = [1, 128], strides = [1, 1]} : vector<8x128xf32> to vector<1x128xf32>
    %63 = vector.broadcast %60 : vector<1x1xf32> to vector<1x128xf32>
    %64 = arith.addf %62, %63 : vector<1x128xf32>
    %cst_29 = arith.constant 0.000000e+00 : f32
    %65 = vector.broadcast %cst_29 : f32 to vector<1x128xf32>
    %66 = arith.maximumf %64, %65 : vector<1x128xf32>
    %c0_30 = arith.constant 0 : index
    %c0_31 = arith.constant 0 : index
    %67 = vector.load %arg8[%c0_30, %c0_31] : memref<1x128xf32, #tpu.memory_space<vmem>>, vector<1x128xf32>
    tpu.vector_store %arg8[%c0_30, %c0_31], %66 {strides = array<i32>} : memref<1x128xf32, #tpu.memory_space<vmem>>, vector<1x128xf32>,
    return
  }
  func.func @transform_0(%arg0: i32) -> (i32, i32) {
    %c0_i32 = arith.constant 0 : i32
    %c0_i32_0 = arith.constant 0 : i32
    return %c0_i32, %arg0 : i32, i32
  }
  func.func @transform_1(%arg0: i32) -> (i32, i32) {
    %c0_i32 = arith.constant 0 : i32
    %c0_i32_0 = arith.constant 0 : i32
    %c0_i32_1 = arith.constant 0 : i32
    return %c0_i32, %c0_i32_0 : i32, i32
  }
  func.func @transform_2(%arg0: i32) -> (i32, i32) {
    %c0_i32 = arith.constant 0 : i32
    %c0_i32_0 = arith.constant 0 : i32
    %c0_i32_1 = arith.constant 0 : i32
    return %c0_i32, %c0_i32_0 : i32, i32
  }
  func.func @transform_3(%arg0: i32) -> (i32, i32) {
    %c0_i32 = arith.constant 0 : i32
    %c0_i32_0 = arith.constant 0 : i32
    %c0_i32_1 = arith.constant 0 : i32
    return %c0_i32, %c0_i32_0 : i32, i32
  }
  func.func @transform_4(%arg0: i32) -> (i32, i32) {
    %c0_i32 = arith.constant 0 : i32
    %c0_i32_0 = arith.constant 0 : i32
    %c0_i32_1 = arith.constant 0 : i32
    return %c0_i32, %c0_i32_0 : i32, i32
  }
  func.func @transform_5(%arg0: i32) -> (i32, i32) {
    %c0_i32 = arith.constant 0 : i32
    %c0_i32_0 = arith.constant 0 : i32
    %c0_i32_1 = arith.constant 0 : i32
    return %c0_i32, %c0_i32_0 : i32, i32
  }
  func.func @transform_6(%arg0: i32) -> (i32, i32) {
    %c0_i32 = arith.constant 0 : i32
    %c0_i32_0 = arith.constant 0 : i32
    %c0_i32_1 = arith.constant 0 : i32
    return %c0_i32, %c0_i32_0 : i32, i32
  }
  func.func @transform_7(%arg0: i32) -> (i32, i32) {
    %c0_i32 = arith.constant 0 : i32
    %c0_i32_0 = arith.constant 0 : i32
    return %c0_i32, %arg0 : i32, i32
  }
}

</mosaic_0001>

<bundles_post_ra>
// kernel: tpu_custom_call.1
= control target key start
LH: loop header
LB: loop body
LE: loop exit
PB: predicated region body
PF: predicated region fallthrough
CT: control target
= control target key end

     0   :  { %s710_s0 = inlined_call_operand.vmem [shape: f32[8,128], index: 0, kind: input, shape index: {}]   ;;  %s711_s1 = inlined_call_operand.vmem [shape: f32[32,8], index: 1, kind: input, shape index: {}]   ;;  %s712_s2 = inlined_call_operand.vmem [shape: f32[32,1], index: 2, kind: input, shape index: {}]   ;;  %s713_s3 = inlined_call_operand.vmem [shape: f32[32,32], index: 3, kind: input, shape index: {}]   ;;  %s714_s4 = inlined_call_operand.vmem [shape: f32[32,1], index: 4, kind: input, shape index: {}]   ;;  %s715_s5 = inlined_call_operand.vmem [shape: f32[8,32], index: 5, kind: input, shape index: {}]   ;;  %s716_s6 = inlined_call_operand.<no memory space> [shape: f32[1,1], index: 6, kind: input, shape index: {}]   ;;  %s717_s7 = inlined_call_operand.hbm [shape: f32[1,128], index: 7, kind: output, shape index: {}]  }
   0x1   :  { %v12_v0 = vstv %s716_s6 }
   0x2   :  { %13 = vst [vmem:[#allocation2] sm:$0x1] %v12_v0 }
   0x3   :  { %v29_v1 = vld [vmem:[%s710_s0] sm:$0xff]  ;;  %vm58_vm0 = vcmask 64512   ;;  %v31_v3 = vld [vmem:[%s711_s1 + $0x8] sm:$0xff]  ;;  %v32_v4 = vld [vmem:[%s711_s1 + $0x10] sm:$0xff]  ;;  %v585_v6 = vmov 0  }
   0x4   :  { %v30_v2 = vld [vmem:[%s711_s1] sm:$0xff]  ;;  %503 = vmatprep.subr.mxu0 %v29_v1  ;;  %555 = vset.pattern.permute.xlu0 %v585_v6  ;;  %v36_v7 = vld [vmem:[%s712_s2 + $0x10] sm:$0xff]  ;;  %v33_v8 = vld [vmem:[%s711_s1 + $0x18] sm:$0xff] }
   0x5   :  { %505 = vmatprep.mubr.msk.f32.mxu0 %vm58_vm0, %v30_v2  ;;  %v34_v5 = vld [vmem:[%s712_s2] sm:$0xff]  ;;  %504 = vmatpush3.msra.mxu0 %v29_v1  ;;  %v35_v9 = vld [vmem:[%s712_s2 + $0x8] sm:$0xff] }
   0x6   :  { %506 = vmatmul.mubr.msk.f32.vlgmr.msra.gmra.mrb[0].mxu0 %vm58_vm0, %v31_v3  ;;  %40 = vperm.xlu0 %555, %v34_v5  }
   0x7   :  { %508 = vmatprep.mubr.msk.f32.mxu0 %vm58_vm0, %v32_v4  ;;  %556 = vset.pattern.permute.xlu1 %v585_v6 }
   0x8   :  { %14 = vsyncpa [#allocation4], 0  ;;  %50 = vperm.xlu1 %556, %v36_v7   ;;  %v37_v10 = vld [vmem:[%s712_s2 + $0x18] sm:$0xff]  ;;  %v207_v11 = vld [vmem:[%s714_s4] sm:$0xff]  ;;  %vm231_vm1 = vcmask 261120   ;;  %vm587_vm2 = vmmov 0  }
   0x9   :  { %v208_v12 = vld [vmem:[%s714_s4 + $0x8] sm:$0xff]  ;;  %v209_v13 = vld [vmem:[%s714_s4 + $0x10] sm:$0xff]  ;;  %v210_v14 = vld [vmem:[%s714_s4 + $0x18] sm:$0xff]  ;;  %s589_s10 = smov [#allocation3]  }
   0xa   :  { %509 = vmatmul.mubr.msk.f32.gmra.mrb[2].mxu0 %vm58_vm0, %v33_v8  ;;  %45 = vperm.xlu0 %555, %v35_v9   ;;  %v376_v15 = vld [vmem:[#allocation2] sm:$0x1]  ;;  %s468_s6 = sshll.u32 %s589_s10, 4  ;;  %s469_s6 = int_to_ptr.vmem [resolvable:$true] %s468_s6 }
   0xb   :  { %v203_v16 = vld [vmem:[%s713_s3] sm:$0xff]  ;;  %s561_s11 = scalar_lea.vmem %s469_s6, 16  ;;  %s565_s0 = scalar_lea.vmem %s469_s6, 32 }
   0xc   :  { %55 = vperm.xlu1 %556, %v37_v10   ;;  %519 = vmatprep.mubr.msk.f32.mxu1 %vm231_vm1, %v203_v16  ;;  %v586_v16 = vmov 0.0|0.0   ;;  %p562_p0 = scmp.ne.s32.totalorder %s469_s6, %s561_s11  ;;  %p566_p1 = scmp.lt.s32.totalorder %s469_s6, %s469_s6 }
   0xd   :  { %544 = vmatprep.subr.bf16.mxu0 %v586_v16  ;;  %p567_p2 = scmp.lt.s32.totalorder %s565_s0, %s561_s11 }
   0xe   :  { %213 = vperm.xlu0 %555, %v207_v11  }
   0xf   :  { %p568_p3 = por %p567_p2, %p566_p1 }
  0x10   :  { %218 = vperm.xlu1 %556, %v208_v12  }
  0x11   :  { %p569_p4 = pnand %p568_p3, %p562_p0 }
  0x12   :  { %223 = vperm.xlu0 %555, %v209_v13   ;;  %v204_v13 = vld [vmem:[%s713_s3 + $0x8] sm:$0xff] }
  0x14   :  { %228 = vperm.xlu1 %556, %v210_v14   ;;  %v205_v14 = vld [vmem:[%s713_s3 + $0x10] sm:$0xff] }
  0x16   :  { %452 = vperm.xlu0 %555, %v376_v15   ;;  %v206_v15 = vld [vmem:[%s713_s3 + $0x18] sm:$0xff] }
  0x85   :  { %v41_v17 = vpop.permute.xlu0 %40 }
  0x87   :  { %v51_v18 = vpop.permute.xlu1 %50 }
  0x89   :  { %v46_v19 = vpop.permute.xlu0 %45 }
  0x8b   :  { %v56_v25 = vpop.permute.xlu1 %55 }
  0xd9   :  { %v507_v20 = vpop.f32.mrb[0].mxu0 }
  0xda   :  { %v143_v21 = vadd.f32 %v507_v20, %v46_v19  ;;  %v137_v22 = vpop.f32.mrb[1].mxu0  ;;  %v214_v19 = vpop.permute.xlu0 %213 }
  0xdb   :  { %v138_v23 = vadd.f32 %v137_v22, %v41_v17  ;;  %v588_v17 = vmov 0.0  }
  0xdc   :  { %v157_v24 = vmul.f32 0.01, %v143_v21  ;;  %533 = vmatprep.mubr.msk.f32.mxu0 %vm587_vm2, %v588_v17 }
  0xdd   :  { %v156_v26 = vmul.f32 0.01, %v138_v23  ;;  %v510_v27 = vpop.f32.mrb[2].mxu0 }
  0xde   :  { %v161_v28 = vmax.f32 %v143_v21, %v157_v24  ;;  %v153_v29 = vadd.f32 %v510_v27, %v56_v25  ;;  %v147_v30 = vpop.f32.mrb[3].mxu0 }
  0xdf   :  { %v160_v31 = vmax.f32 %v138_v23, %v156_v26  ;;  %v148_v32 = vadd.f32 %v147_v30, %v51_v18  ;;  %v219_v18 = vpop.permute.xlu1 %218 }
  0xe0   :  { %v176_v33 = vmul.f32 %v161_v28, %v161_v28  ;;  %v159_v34 = vmul.f32 0.01, %v153_v29 }
  0xe1   :  { %v164_v35 = vadd.f32 %v161_v28, %v160_v31  ;;  %v175_v36 = vmul.f32 %v160_v31, %v160_v31  ;;  %v158_v37 = vmul.f32 0.01, %v148_v32 }
  0xe2   :  { %v163_v39 = vmax.f32 %v153_v29, %v159_v34 }
  0xe3   :  { %v179_v38 = vadd.f32 %v176_v33, %v175_v36  ;;  %v162_v40 = vmax.f32 %v148_v32, %v158_v37  ;;  %v229_v25 = vpop.permute.xlu1 %228 }
  0xe4   :  { %v178_v43 = vmul.f32 %v163_v39, %v163_v39 }
  0xe5   :  { %v165_v41 = vadd.f32 %v164_v35, %v162_v40  ;;  %v177_v42 = vmul.f32 %v162_v40, %v162_v40 }
  0xe7   :  { %v166_v44 = vadd.f32 %v165_v41, %v163_v39  ;;  %v180_v45 = vadd.f32 %v179_v38, %v177_v42 }
  0xe9   :  { %v167_v46 = vrot.slane %v166_v44, 4  ;;  %v181_v47 = vadd.f32 %v180_v45, %v178_v43 }
  0xeb   :  { %v168_v48 = vadd.f32 %v167_v46, %v166_v44  ;;  %v182_v49 = vrot.slane %v181_v47, 4 }
  0xed   :  { %v169_v50 = vrot.slane %v168_v48, 2  ;;  %v183_v51 = vadd.f32 %v182_v49, %v181_v47 }
  0xef   :  { %v170_v52 = vadd.f32 %v169_v50, %v168_v48  ;;  %v184_v53 = vrot.slane %v183_v51, 2 }
  0xf1   :  { %v171_v54 = vrot.slane %v170_v52, 1  ;;  %v185_v55 = vadd.f32 %v184_v53, %v183_v51 }
  0xf3   :  { %v172_v56 = vadd.f32 %v171_v54, %v170_v52  ;;  %v186_v57 = vrot.slane %v185_v55, 1 }
  0xf5   :  { %v174_v58 = vmul.f32 0.03125, %v172_v56  ;;  %v187_v59 = vadd.f32 %v186_v57, %v185_v55 }
  0xf7   :  { %v188_v60 = vmul.f32 0.03125, %v187_v59  ;;  %v189_v61 = vmul.f32 %v174_v58, %v174_v58 }
  0xf9   :  { %v190_v62 = vsub.f32 %v188_v60, %v189_v61 }
  0xfb   :  { %v191_v63 = vmax.f32 %v190_v62, 0.0 }
  0xfd   :  { %v192_v0 = vadd.f32 1e-05, %v191_v63 }
  0xff   :  { %557 = vrsqrt.f32 %v192_v0 }
 0x109   :  { %v558_v1 = vpop.eup %557 }
 0x10a   :  { %v196_v2 = vmul.f32 %v558_v1, %v162_v40  ;;  %v194_v3 = vmul.f32 %v558_v1, %v160_v31  ;;  %v195_v4 = vmul.f32 %v558_v1, %v161_v28  ;;  %v198_v5 = vmul.f32 %v558_v1, %v174_v58  ;;  %v224_v28 = vpop.permute.xlu0 %223 }
 0x10b   :  { %v197_v6 = vmul.f32 %v558_v1, %v163_v39 }
 0x10c   :  { %v199_v7 = vsub.f32 %v194_v3, %v198_v5  ;;  %v200_v8 = vsub.f32 %v195_v4, %v198_v5  ;;  %v201_v9 = vsub.f32 %v196_v2, %v198_v5 }
 0x10d   :  { %v202_v10 = vsub.f32 %v197_v6, %v198_v5 }
 0x10e   :  { %v536_v11 = vpack.c.bf16 %v200_v8, %v199_v7 }
 0x10f   :  { %v540_v12 = vpack.c.bf16 %v202_v10, %v201_v9 }
 0x110   :  { %537 = vmatprep.subr.bf16.mxu1 %v536_v11 }
 0x111   :  { %539 = vmatpush3.bf16.msra.mxu1 %v536_v11 }
 0x112   :  { %541 = vmatprep.subr.bf16.mxu1 %v540_v12 }
 0x115   :  { %543 = vmatpush3.bf16.msra.mxu1 %v540_v12 }
 0x118   :  { %520 = vmatmul.mubr.msk.f32.vlgmr.msra.gmra.mrb[0].mxu1 %vm231_vm1, %v204_v13 }
 0x119   :  { %522 = vmatprep.mubr.msk.f32.mxu1 %vm231_vm1, %v205_v14  ;;  %v375_v14 = vld [vmem:[%s715_s5] sm:$0xff] }
 0x11c   :  { %523 = vmatmul.mubr.msk.f32.gmra.mrb[2].mxu1 %vm231_vm1, %v206_v15  ;;  %v455_v15 = vlaneseq }
 0x11e   :  { %v456_v17 = vshrl.u32 %v455_v15, 7 }
 0x1eb   :  { %v521_v20 = vpop.f32.mrb[0].mxu1 }
 0x1ec   :  { %v316_v21 = vadd.f32 %v521_v20, %v219_v18  ;;  %v310_v22 = vpop.f32.mrb[1].mxu1  ;;  %v457_v18 = vsub.s32 0, %v456_v17 }
 0x1ed   :  { %v311_v23 = vadd.f32 %v310_v22, %v214_v19  ;;  %v453_v19 = vpop.permute.xlu0 %452 }
 0x1ee   :  { %v330_v24 = vmul.f32 0.01, %v316_v21  ;;  %v458_v20 = vrot.slane %v453_v19, %v457_v18 }
 0x1ef   :  { %v329_v26 = vmul.f32 0.01, %v311_v23  ;;  %v524_v27 = vpop.f32.mrb[2].mxu1 }
 0x1f0   :  { %v334_v29 = vmax.f32 %v316_v21, %v330_v24  ;;  %v326_v30 = vadd.f32 %v524_v27, %v229_v25  ;;  %v320_v31 = vpop.f32.mrb[3].mxu1 }
 0x1f1   :  { %v333_v32 = vmax.f32 %v311_v23, %v329_v26  ;;  %v321_v33 = vadd.f32 %v320_v31, %v224_v28 }
 0x1f2   :  { %v348_v34 = vmul.f32 %v334_v29, %v334_v29  ;;  %v332_v35 = vmul.f32 0.01, %v326_v30 }
 0x1f3   :  { %v337_v36 = vadd.f32 %v334_v29, %v333_v32  ;;  %v347_v37 = vmul.f32 %v333_v32, %v333_v32  ;;  %v331_v38 = vmul.f32 0.01, %v321_v33 }
 0x1f4   :  { %v336_v40 = vmax.f32 %v326_v30, %v332_v35 }
 0x1f5   :  { %v351_v39 = vadd.f32 %v348_v34, %v347_v37  ;;  %v335_v41 = vmax.f32 %v321_v33, %v331_v38 }
 0x1f6   :  { %v350_v44 = vmul.f32 %v336_v40, %v336_v40 }
 0x1f7   :  { %v338_v42 = vadd.f32 %v337_v36, %v335_v41  ;;  %v349_v43 = vmul.f32 %v335_v41, %v335_v41 }
 0x1f9   :  { %v339_v45 = vadd.f32 %v338_v42, %v336_v40  ;;  %v352_v46 = vadd.f32 %v351_v39, %v349_v43 }
 0x1fb   :  { %v340_v47 = vrot.slane %v339_v45, 4  ;;  %v353_v48 = vadd.f32 %v352_v46, %v350_v44 }
 0x1fd   :  { %v341_v49 = vadd.f32 %v340_v47, %v339_v45  ;;  %v354_v50 = vrot.slane %v353_v48, 4 }
 0x1ff   :  { %v342_v51 = vrot.slane %v341_v49, 2  ;;  %v355_v52 = vadd.f32 %v354_v50, %v353_v48 }
 0x201   :  { %v343_v53 = vadd.f32 %v342_v51, %v341_v49  ;;  %v356_v54 = vrot.slane %v355_v52, 2 }
 0x203   :  { %v344_v55 = vrot.slane %v343_v53, 1  ;;  %v357_v56 = vadd.f32 %v356_v54, %v355_v52 }
 0x205   :  { %v345_v57 = vadd.f32 %v344_v55, %v343_v53  ;;  %v358_v58 = vrot.slane %v357_v56, 1 }
 0x207   :  { %v346_v59 = vmul.f32 0.03125, %v345_v57  ;;  %v359_v60 = vadd.f32 %v358_v58, %v357_v56 }
 0x209   :  { %v360_v61 = vmul.f32 0.03125, %v359_v60  ;;  %v361_v62 = vmul.f32 %v346_v59, %v346_v59 }
 0x20b   :  { %v362_v63 = vsub.f32 %v360_v61, %v361_v62 }
 0x20d   :  { %v363_v0 = vmax.f32 %v362_v63, 0.0 }
 0x20f   :  { %v364_v1 = vadd.f32 1e-05, %v363_v0 }
 0x211   :  { %559 = vrsqrt.f32 %v364_v1 }
 0x21b   :  { %v560_v2 = vpop.eup %559 }
 0x21c   :  { %v368_v3 = vmul.f32 %v560_v2, %v335_v41  ;;  %v370_v4 = vmul.f32 %v560_v2, %v346_v59  ;;  %v366_v5 = vmul.f32 %v560_v2, %v333_v32  ;;  %v367_v6 = vmul.f32 %v560_v2, %v334_v29 }
 0x21d   :  { %v369_v7 = vmul.f32 %v560_v2, %v336_v40 }
 0x21e   :  { %v373_v8 = vsub.f32 %v368_v3, %v370_v4  ;;  %v371_v9 = vsub.f32 %v366_v5, %v370_v4  ;;  %v372_v10 = vsub.f32 %v367_v6, %v370_v4 }
 0x21f   :  { %v374_v11 = vsub.f32 %v369_v7, %v370_v4 }
 0x220   :  { %v545_v12 = vpack.c.bf16 %v372_v10, %v371_v9 }
 0x221   :  { %v548_v13 = vpack.c.bf16 %v374_v11, %v373_v8 }
 0x222   :  { %546 = vmatpush3.bf16.msra.mxu0 %v545_v12 }
 0x223   :  { %547 = vmatprep.subr.bf16.mxu0 %v586_v16 }
 0x226   :  { %549 = vmatpush3.bf16.msra.mxu0 %v548_v13 }
 0x229   :  { %534 = vmatmul.mubr.msk.f32.vlgmr.msra.gmra.mrb[4].mxu0 %vm231_vm1, %v375_v14 }
 0x2fc   :  { %v446_v21 = vpop.f32.mrb[4].mxu0 }
 0x2fd   :  { %v459_v22 = vadd.f32 %v458_v20, %v446_v21  ;;  %v535_v23 = vpop.f32.mrb[5].mxu0 }
 0x2ff   :  { %v460_v24 = vmax.f32 %v459_v22, 0.0 }
 0x301   :  { %461 = vst [vmem:[#allocation3] sm:$0x1] %v460_v24 }
 0x302   :  { %572 = shalt.err (!%p569_p4)
}
 0x303   :  { %s573_s13 = scalar_lea.hbm %s717_s7, 16 }
 0x304   :  { %p574_p5 = scmp.ne.s32.totalorder %s717_s7, %s573_s13  ;;  %p577_p6 = scmp.lt.u32.totalorder %s573_s13, %s717_s7 }
 0x306   :  { %p579_p7 = pnand %p577_p6, %p574_p5 }
 0x308   :  { %582 = shalt.err (!%p579_p7)
}
 0x309   :  { %471 = dma.vmem_to_hbm [thread:$0]  %s469_s6, 16, %s717_s7, [#allocation4]  }
 0x30a   :  { %583 = dma.done.wait [#allocation4], 16  }
 0x30b   :  { %584 = vsyncadd [#allocation4], 4294967280 }
 0x30c   :  { %475 = vsyncpa [#allocation4], 1 }

</bundles_post_ra>
